<compile_context>
chip_gen: v5e
topology: v5e:2x2
jax: 0.10.0
libtpu: 0.0.40
codegen_flags: <defaults>
</compile_context>

<pallas_src>
import jax
import jax.numpy as jnp
from jax.experimental import pallas as pl
from jax.experimental.pallas import tpu as pltpu


def _round_up(a: int, b: int) -> int:
    return (a + b - 1) // b * b


def make_diffusion_kernel(layer_num: int, tn: int, step: float,
                          adj_resident: bool):
    """Kernel with static layer_num / tile size / step / residency baked in.

    Grid = (layer_num, num_row_blocks); layer axis outer (sequential), row
    blocks inner, so all blocks of layer j finish before layer j+1 starts.
    """

    def kernel(x0_hbm, adj_in, degp_ref, w2_ref, b2_ref, out_ref,
               xf32_ref, x16_ref, *rest):
        if adj_resident:
            adj_vmem, sem = rest
        else:
            (sem,) = rest

        j = pl.program_id(0)                  # diffusion layer index
        i = pl.program_id(1)                  # row-block index
        row0 = pl.multiple_of(i * tn, tn)

        # Very first grid step: DMA x0 (and adj, if resident) from HBM into
        # the persistent VMEM state, seed the bf16 RHS ping-pong buffer 0.
        @pl.when((j == 0) & (i == 0))
        def _init():
            cx = pltpu.make_async_copy(x0_hbm, xf32_ref, sem.at[0])
            cx.start()
            if adj_resident:
                ca = pltpu.make_async_copy(adj_in, adj_vmem, sem.at[1])
                ca.start()
                ca.wait()
            cx.wait()
            x16_ref[0] = xf32_ref[...].astype(jnp.bfloat16)

        src = j % 2                           # RHS buffer holding layer-(j-1) state

        if adj_resident:
            adj_blk = adj_vmem[pl.ds(row0, tn), :]
        else:
            adj_blk = adj_in[...]

        # Diffusion update for this row block (f32 state, f32 accumulation):
        #   y = deg' * x_blk + step * (adj_blk @ x_prev)
        x_blk = xf32_ref[pl.ds(row0, tn), :]          # f32, not yet updated
        deg_blk = degp_ref[pl.ds(row0, tn), :]        # f32 (tn, 1)
        agg = jnp.dot(adj_blk, x16_ref[src],
                      preferred_element_type=jnp.float32)
        y_blk = deg_blk * x_blk + step * agg

        # In-place f32 state update (safe: these rows are read exactly once
        # per layer, above, and the matmul RHS is the separate x16 buffer).
        xf32_ref[pl.ds(row0, tn), :] = y_blk
        y16 = y_blk.astype(jnp.bfloat16)

        # Per-block refresh of next layer's bf16 RHS (no full-array cast).
        @pl.when(j < layer_num - 1)
        def _stash():
            x16_ref[1 - src, pl.ds(row0, tn), :] = y16

        # Fused classifier, final layer only (bf16 operands, f32 accumulate).
        @pl.when(j == layer_num - 1)
        def _classify():
            out_ref[...] = (jnp.dot(y16, w2_ref[...],
                                    preferred_element_type=jnp.float32)
                            + b2_ref[...])

    return kernel


def diffusion_net_forward(x, adj, degrees, w1, b1, w2, b2, *, step, layer_num):
    """x:[N,F]  adj:[N,N]  degrees:[N] (diag of the 'diagonal' matrix)
       w1:[F,F] (pre-transposed)  b1:[1,F]  w2:[F,C] (pre-transposed)  b2:[1,C]"""
    assert layer_num >= 1, "layer_num must be >= 1"
    N, F = x.shape
    C = w2.shape[1]
    f32 = jnp.float32

    # Initial linear + relu done once by XLA (was a once-used resident VMEM
    # operand inside the kernel).
    x0 = x.astype(f32)
    x0 = x0 + jax.nn.relu(x0 @ w1.astype(f32) + b1.reshape(1, -1).astype(f32))

    # Padded / tiled sizes: nodes -> multiple of 8 (sublane) and of the row
    # tile; features / classes -> multiples of 128 (lane-dense).
    N8 = _round_up(N, 8)
    TN = min(N8, 512)
    while TN > 8 and _round_up(N8, TN) > N8 + max(64, N8 // 8):
        TN //= 2                      # avoid gross over-padding of small graphs
    N_pad = _round_up(N8, TN)
    F_pad = _round_up(F, 128)
    C_pad = _round_up(C, 128)
    nb = N_pad // TN

    x0_p = jnp.zeros((N_pad, F_pad), f32).at[:N, :F].set(x0)
    # Exact 0/1 adjacency in bf16 (step is applied after the matmul, in f32).
    adj_p = jnp.zeros((N_pad, N_pad), jnp.bfloat16).at[:N, :N].set(
        adj.astype(jnp.bfloat16))
    degp = jnp.ones((N_pad, 1), f32).at[:N, 0].set(
        1.0 - step * degrees.astype(f32))
    w2_p = jnp.zeros((F_pad, C_pad), jnp.bfloat16).at[:F, :C].set(
        w2.astype(jnp.bfloat16))
    b2_p = jnp.zeros((1, C_pad), f32).at[0, :C].set(b2.reshape(-1).astype(f32))

    # VMEM budget from the actual chip (85% cap leaves compiler headroom);
    # conservative 64 MiB fallback if the query is unavailable.
    try:
        vmem_cap = int(pltpu.get_tpu_info().vmem_capacity_bytes)
    except Exception:
        vmem_cap = 64 << 20
    vmem_budget = int(vmem_cap * 0.85)

    state_bytes = (N_pad * F_pad * 4            # f32 x state (in place)
                   + 2 * N_pad * F_pad * 2      # bf16 RHS ping-pong
                   + 2 * N_pad * 4              # deg' (double-buffered const)
                   + 2 * F_pad * C_pad * 2      # w2
                   + 2 * C_pad * 4              # b2
                   + 2 * TN * C_pad * 4)        # out block (double-buffered)
    adj_resident = (state_bytes + N_pad * N_pad * 2 + (6 << 20)) <= vmem_budget

    const = lambda j, i: (0, 0)
    row_blk = lambda j, i: (i, 0)
    last = layer_num - 1
    # Non-final layers all map to block (0,0) -> no garbage HBM writebacks.
    out_map = lambda j, i: (jnp.where(j == last, i, 0), 0)

    in_specs = [
        pl.BlockSpec(memory_space=pl.ANY),                    # x0 (HBM, init DMA)
        (pl.BlockSpec(memory_space=pl.ANY) if adj_resident    # adj resident
         else pl.BlockSpec((TN, N_pad), row_blk)),            # ... or streamed
        pl.BlockSpec((N_pad, 1), const),                      # deg'
        pl.BlockSpec((F_pad, C_pad), const),                  # w2 (bf16)
        pl.BlockSpec((1, C_pad), const),                      # b2
    ]
    out_spec = pl.BlockSpec((TN, C_pad), out_map)

    scratch = [
        pltpu.VMEM((N_pad, F_pad), jnp.float32),              # f32 x state
        pltpu.VMEM((2, N_pad, F_pad), jnp.bfloat16),          # bf16 RHS ping-pong
    ]
    if adj_resident:
        scratch.append(pltpu.VMEM((N_pad, N_pad), jnp.bfloat16))
    scratch.append(pltpu.SemaphoreType.DMA((2,)))

    adj_hbm_bytes = N_pad * N_pad * 2 * (1 if adj_resident else layer_num)
    flops = 2 * (layer_num * N_pad * N_pad * F_pad + N_pad * F_pad * C_pad)
    bytes_accessed = (adj_hbm_bytes + N_pad * F_pad * 4 + N_pad * C_pad * 4
                      + N_pad * 4 + F_pad * C_pad * 2 + C_pad * 4)

    out = pl.pallas_call(
        make_diffusion_kernel(layer_num, TN, float(step), adj_resident),
        out_shape=jax.ShapeDtypeStruct((N_pad, C_pad), jnp.float32),
        grid_spec=pltpu.PrefetchScalarGridSpec(
            num_scalar_prefetch=0,
            grid=(layer_num, nb),
            in_specs=in_specs,
            out_specs=out_spec,
            scratch_shapes=scratch),
        compiler_params=pltpu.CompilerParams(
            # Both axes sequential: layers depend on each other; row blocks
            # share the in-place x state and the bf16 RHS buffers.
            dimension_semantics=("arbitrary", "arbitrary"),
            vmem_limit_bytes=vmem_budget),
        cost_estimate=pl.CostEstimate(
            flops=flops, transcendentals=0, bytes_accessed=bytes_accessed),
    )(x0_p, adj_p, degp, w2_p, b2_p)

    return out[:N, :C]


def reference_forward(x, adj, diagonal, w1, b1, w2, b2, *, step, layer_num):
    """Pure-JAX f32 reference mirroring the PyTorch module (eval mode)."""
    x = x + jax.nn.relu(x @ w1 + b1)
    L = diagonal - adj
    for _ in range(layer_num):
        x = x - step * (L @ x)
    return x @ w2 + b2


if __name__ == "__main__":
    # Small shapes consistent with the module: N nodes, F features, C classes.
    N, F, C = 16, 32, 8
    step = 0.1
    layer_num = 4
    dropout = 0.5  # unused in eval mode

    key = jax.random.PRNGKey(0)
    kx, kadj, kw1, kb1, kw2, kb2 = jax.random.split(key, 6)

    x = jax.random.normal(kx, (N, F), dtype=jnp.float32)

    # Symmetric 0/1 adjacency with empty diagonal; diagonal matrix = degree matrix.
    a = (jax.random.uniform(kadj, (N, N)) < 0.3).astype(jnp.float32)
    adj = jnp.triu(a, 1)
    adj = adj + adj.T
    degrees = jnp.sum(adj, axis=1)

    # Deterministic parameter init; weights stored pre-transposed so the
    # forward computes x @ W directly.
    w1 = jax.random.normal(kw1, (F, F), dtype=jnp.float32) * 0.1
    b1 = jax.random.normal(kb1, (1, F), dtype=jnp.float32) * 0.1
    w2 = jax.random.normal(kw2, (F, C), dtype=jnp.float32) * 0.1
    b2 = jax.random.normal(kb2, (1, C), dtype=jnp.float32) * 0.1

    out = diffusion_net_forward(
        x, adj, degrees, w1, b1, w2, b2, step=step, layer_num=layer_num)
    out = jax.block_until_ready(out)

    ref = reference_forward(
        x, adj, jnp.diag(degrees), w1, b1, w2, b2, step=step, layer_num=layer_num)
    assert out.shape == (N, C)
    # Tolerance reflects the bf16 aggregation / classifier matmuls (f32 accum).
    assert jnp.allclose(out, ref, atol=2e-2, rtol=2e-2), "mismatch vs reference"

    print("KERNEL_OK")
</pallas_src>

<mosaic_0001>
module attributes {stable_mosaic.version = 11 : i64} {
  func.func @kernel(%arg0: i32, %arg1: i32, %arg2: memref<16x128xf32, #tpu.memory_space<any>>, %arg3: memref<16x16xbf16, #tpu.memory_space<any>>, %arg4: memref<16x1xf32, #tpu.memory_space<vmem>>, %arg5: memref<128x128xbf16, #tpu.memory_space<vmem>>, %arg6: memref<1x128xf32, #tpu.memory_space<vmem>>, %arg7: memref<16x128xf32, #tpu.memory_space<vmem>>, %arg8: memref<16x128xf32, #tpu.memory_space<vmem>>, %arg9: memref<2x16x128xbf16, #tpu.memory_space<vmem>>, %arg10: memref<16x16xbf16, #tpu.memory_space<vmem>>, %arg11: memref<2x!tpu.dma_semaphore, #tpu.memory_space<semaphore_mem>>) attributes {dimension_semantics = [#tpu.dimension_semantics<arbitrary>, #tpu.dimension_semantics<arbitrary>], iteration_bounds = array<i64: 4, 1>, scalar_prefetch = 0 : i64, scratch_operands = 4 : i64, tpu.core_type = #tpu.core_type<tc>, window_params = [{}, {}, {pipeline_mode = #tpu.pipeline_mode<synchronous>, transform_indices = @transform_2, window_bounds = array<i64: 16, 1>}, {pipeline_mode = #tpu.pipeline_mode<synchronous>, transform_indices = @transform_3, window_bounds = array<i64: 128, 128>}, {pipeline_mode = #tpu.pipeline_mode<synchronous>, transform_indices = @transform_4, window_bounds = array<i64: 1, 128>}, {transform_indices = @transform_5, window_bounds = array<i64: 16, 128>}]} {
    %c16_i32 = arith.constant 16 : i32
    %0 = arith.muli %arg1, %c16_i32 : i32
    %1 = tpu.assume_multiple %0, 16 : i32
    %c0_i32 = arith.constant 0 : i32
    %2 = arith.cmpi eq, %arg0, %c0_i32 : i32
    %c0_i32_0 = arith.constant 0 : i32
    %3 = arith.cmpi eq, %arg1, %c0_i32_0 : i32
    %4 = arith.andi %2, %3 : i1
    %5 = arith.extui %4 : i1 to i32
    %c0_i32_1 = arith.constant 0 : i32
    %6 = arith.cmpi ne, %5, %c0_i32_1 : i32
    scf.if %6 {
      %c0_i32_15 = arith.constant 0 : i32
      %41 = tpu.memref_slice %arg11[%c0_i32_15] : memref<2x!tpu.dma_semaphore, #tpu.memory_space<semaphore_mem>> -> memref<1x!tpu.dma_semaphore, #tpu.memory_space<semaphore_mem>>
      %42 = tpu.memref_squeeze %41 : memref<1x!tpu.dma_semaphore, #tpu.memory_space<semaphore_mem>> -> memref<!tpu.dma_semaphore, #tpu.memory_space<semaphore_mem>>
      tpu.enqueue_dma source(%arg2 : memref<16x128xf32, #tpu.memory_space<any>>) target(%arg8 : memref<16x128xf32, #tpu.memory_space<vmem>>) target_semaphore(%42 : memref<!tpu.dma_semaphore, #tpu.memory_space<semaphore_mem>>)
      %c1_i32_16 = arith.constant 1 : i32
      %43 = tpu.memref_slice %arg11[%c1_i32_16] : memref<2x!tpu.dma_semaphore, #tpu.memory_space<semaphore_mem>> -> memref<1x!tpu.dma_semaphore, #tpu.memory_space<semaphore_mem>>
      %44 = tpu.memref_squeeze %43 : memref<1x!tpu.dma_semaphore, #tpu.memory_space<semaphore_mem>> -> memref<!tpu.dma_semaphore, #tpu.memory_space<semaphore_mem>>
      tpu.enqueue_dma source(%arg3 : memref<16x16xbf16, #tpu.memory_space<any>>) target(%arg10 : memref<16x16xbf16, #tpu.memory_space<vmem>>) target_semaphore(%44 : memref<!tpu.dma_semaphore, #tpu.memory_space<semaphore_mem>>)
      %c1_i32_17 = arith.constant 1 : i32
      %45 = tpu.memref_slice %arg11[%c1_i32_17] : memref<2x!tpu.dma_semaphore, #tpu.memory_space<semaphore_mem>> -> memref<1x!tpu.dma_semaphore, #tpu.memory_space<semaphore_mem>>
      %46 = tpu.memref_squeeze %45 : memref<1x!tpu.dma_semaphore, #tpu.memory_space<semaphore_mem>> -> memref<!tpu.dma_semaphore, #tpu.memory_space<semaphore_mem>>
      tpu.wait_dma2 semaphore(%46 : memref<!tpu.dma_semaphore, #tpu.memory_space<semaphore_mem>>) src(%arg3 : memref<16x16xbf16, #tpu.memory_space<any>>) dst(%arg10 : memref<16x16xbf16, #tpu.memory_space<vmem>>)
      %c0_i32_18 = arith.constant 0 : i32
      %47 = tpu.memref_slice %arg11[%c0_i32_18] : memref<2x!tpu.dma_semaphore, #tpu.memory_space<semaphore_mem>> -> memref<1x!tpu.dma_semaphore, #tpu.memory_space<semaphore_mem>>
      %48 = tpu.memref_squeeze %47 : memref<1x!tpu.dma_semaphore, #tpu.memory_space<semaphore_mem>> -> memref<!tpu.dma_semaphore, #tpu.memory_space<semaphore_mem>>
      tpu.wait_dma2 semaphore(%48 : memref<!tpu.dma_semaphore, #tpu.memory_space<semaphore_mem>>) src(%arg2 : memref<16x128xf32, #tpu.memory_space<any>>) dst(%arg8 : memref<16x128xf32, #tpu.memory_space<vmem>>)
      %c0_19 = arith.constant 0 : index
      %c0_20 = arith.constant 0 : index
      %49 = vector.load %arg8[%c0_19, %c0_20] : memref<16x128xf32, #tpu.memory_space<vmem>>, vector<16x128xf32>
      %50 = arith.truncf %49 : vector<16x128xf32> to vector<16x128xbf16>
      %c0_21 = arith.constant 0 : index
      %c0_22 = arith.constant 0 : index
      %c0_23 = arith.constant 0 : index
      %51 = vector.load %arg9[%c0_21, %c0_22, %c0_23] : memref<2x16x128xbf16, #tpu.memory_space<vmem>>, vector<1x16x128xbf16>
      %52 = vector.shape_cast %51 : vector<1x16x128xbf16> to vector<16x128xbf16>
      %53 = vector.shape_cast %50 : vector<16x128xbf16> to vector<1x16x128xbf16>
      tpu.vector_store %arg9[%c0_21, %c0_22, %c0_23], %53 {strides = array<i32>} : memref<2x16x128xbf16, #tpu.memory_space<vmem>>, vector<1x16x128xbf16>,
    } else {
    }
    %c2_i32 = arith.constant 2 : i32
    %c0_i32_2 = arith.constant 0 : i32
    %7 = arith.cmpi eq, %c2_i32, %c0_i32_2 : i32
    %c1_i32 = arith.constant 1 : i32
    %8 = arith.select %7, %c1_i32, %c2_i32 : i32
    %9 = arith.remsi %arg0, %8 : i32
    %c0_i32_3 = arith.constant 0 : i32
    %10 = arith.cmpi ne, %9, %c0_i32_3 : i32
    %c0_i32_4 = arith.constant 0 : i32
    %11 = arith.cmpi slt, %9, %c0_i32_4 : i32
    %c0_i32_5 = arith.constant 0 : i32
    %12 = arith.cmpi slt, %8, %c0_i32_5 : i32
    %13 = arith.xori %11, %12 : i1
    %14 = arith.andi %13, %10 : i1
    %15 = arith.addi %9, %8 : i32
    %16 = arith.select %14, %15, %9 : i32
    %17 = arith.index_cast %1 : i32 to index
    %c0 = arith.constant 0 : index
    %18 = vector.load %arg10[%17, %c0] : memref<16x16xbf16, #tpu.memory_space<vmem>>, vector<16x16xbf16>
    %19 = arith.index_cast %1 : i32 to index
    %c0_6 = arith.constant 0 : index
    %20 = vector.load %arg8[%19, %c0_6] : memref<16x128xf32, #tpu.memory_space<vmem>>, vector<16x128xf32>
    %21 = arith.index_cast %1 : i32 to index
    %c0_7 = arith.constant 0 : index
    %22 = vector.load %arg4[%21, %c0_7] : memref<16x1xf32, #tpu.memory_space<vmem>>, vector<16x1xf32>
    %23 = arith.index_cast %16 : i32 to index
    %c0_8 = arith.constant 0 : index
    %c0_9 = arith.constant 0 : index
    %24 = vector.load %arg9[%23, %c0_8, %c0_9] : memref<2x16x128xbf16, #tpu.memory_space<vmem>>, vector<1x16x128xbf16>
    %25 = vector.shape_cast %24 : vector<1x16x128xbf16> to vector<16x128xbf16>
    %cst = arith.constant dense<0.000000e+00> : vector<16x128xf32>
    %26 = tpu.matmul %18, %25, %cst {dimension_numbers = #tpu.dot_dimension_numbers<[1], [0], [0], [1], [0, 0, 1, 1], [], []>} : vector<16x16xbf16>, vector<16x128xbf16>, vector<16x128xf32> -> vector<16x128xf32>
    %27 = vector.broadcast %22 : vector<16x1xf32> to vector<16x128xf32>
    %28 = arith.mulf %27, %20 : vector<16x128xf32>
    %cst_10 = arith.constant 1.000000e-01 : f32
    %29 = vector.broadcast %cst_10 : f32 to vector<16x128xf32>
    %30 = arith.mulf %29, %26 : vector<16x128xf32>
    %31 = arith.addf %28, %30 : vector<16x128xf32>
    %32 = arith.index_cast %1 : i32 to index
    %c0_11 = arith.constant 0 : index
    %33 = vector.load %arg8[%32, %c0_11] : memref<16x128xf32, #tpu.memory_space<vmem>>, vector<16x128xf32>
    tpu.vector_store %arg8[%32, %c0_11], %31 {strides = array<i32>} : memref<16x128xf32, #tpu.memory_space<vmem>>, vector<16x128xf32>,
    %34 = arith.truncf %31 : vector<16x128xf32> to vector<16x128xbf16>
    %c3_i32 = arith.constant 3 : i32
    %35 = arith.cmpi slt, %arg0, %c3_i32 : i32
    %36 = arith.extui %35 : i1 to i32
    %c0_i32_12 = arith.constant 0 : i32
    %37 = arith.cmpi ne, %36, %c0_i32_12 : i32
    scf.if %37 {
      %c1_i32_15 = arith.constant 1 : i32
      %41 = arith.subi %c1_i32_15, %16 : i32
      %42 = arith.index_cast %41 : i32 to index
      %43 = arith.index_cast %1 : i32 to index
      %c0_16 = arith.constant 0 : index
      %44 = vector.load %arg9[%42, %43, %c0_16] : memref<2x16x128xbf16, #tpu.memory_space<vmem>>, vector<1x16x128xbf16>
      %45 = vector.shape_cast %44 : vector<1x16x128xbf16> to vector<16x128xbf16>
      %46 = vector.shape_cast %34 : vector<16x128xbf16> to vector<1x16x128xbf16>
      tpu.vector_store %arg9[%42, %43, %c0_16], %46 {strides = array<i32>} : memref<2x16x128xbf16, #tpu.memory_space<vmem>>, vector<1x16x128xbf16>,
    } else {
    }
    %c3_i32_13 = arith.constant 3 : i32
    %38 = arith.cmpi eq, %arg0, %c3_i32_13 : i32
    %39 = arith.extui %38 : i1 to i32
    %c0_i32_14 = arith.constant 0 : i32
    %40 = arith.cmpi ne, %39, %c0_i32_14 : i32
    scf.if %40 {
      %c0_15 = arith.constant 0 : index
      %c0_16 = arith.constant 0 : index
      %41 = vector.load %arg5[%c0_15, %c0_16] : memref<128x128xbf16, #tpu.memory_space<vmem>>, vector<128x128xbf16>
      %cst_17 = arith.constant dense<0.000000e+00> : vector<16x128xf32>
      %42 = tpu.matmul %34, %41, %cst_17 {dimension_numbers = #tpu.dot_dimension_numbers<[1], [0], [0], [1], [0, 0, 1, 1], [], []>} : vector<16x128xbf16>, vector<128x128xbf16>, vector<16x128xf32> -> vector<16x128xf32>
      %c0_18 = arith.constant 0 : index
      %c0_19 = arith.constant 0 : index
      %43 = vector.load %arg6[%c0_18, %c0_19] : memref<1x128xf32, #tpu.memory_space<vmem>>, vector<1x128xf32>
      %44 = vector.broadcast %43 : vector<1x128xf32> to vector<16x128xf32>
      %45 = arith.addf %42, %44 : vector<16x128xf32>
      %c0_20 = arith.constant 0 : index
      %c0_21 = arith.constant 0 : index
      %46 = vector.load %arg7[%c0_20, %c0_21] : memref<16x128xf32, #tpu.memory_space<vmem>>, vector<16x128xf32>
      tpu.vector_store %arg7[%c0_20, %c0_21], %45 {strides = array<i32>} : memref<16x128xf32, #tpu.memory_space<vmem>>, vector<16x128xf32>,
    } else {
    }
    return
  }
  func.func @transform_2(%arg0: i32, %arg1: i32) -> (i32, i32) {
    %c0_i32 = arith.constant 0 : i32
    %c0_i32_0 = arith.constant 0 : i32
    %c0_i32_1 = arith.constant 0 : i32
    return %c0_i32, %c0_i32_0 : i32, i32
  }
  func.func @transform_3(%arg0: i32, %arg1: i32) -> (i32, i32) {
    %c0_i32 = arith.constant 0 : i32
    %c0_i32_0 = arith.constant 0 : i32
    %c0_i32_1 = arith.constant 0 : i32
    return %c0_i32, %c0_i32_0 : i32, i32
  }
  func.func @transform_4(%arg0: i32, %arg1: i32) -> (i32, i32) {
    %c0_i32 = arith.constant 0 : i32
    %c0_i32_0 = arith.constant 0 : i32
    %c0_i32_1 = arith.constant 0 : i32
    return %c0_i32, %c0_i32_0 : i32, i32
  }
  func.func @transform_5(%arg0: i32, %arg1: i32) -> (i32, i32) {
    %c3_i32 = arith.constant 3 : i32
    %0 = arith.cmpi eq, %arg0, %c3_i32 : i32
    %c0_i32 = arith.constant 0 : i32
    %1 = arith.select %0, %arg1, %c0_i32 : i32
    %c0_i32_0 = arith.constant 0 : i32
    %c0_i32_1 = arith.constant 0 : i32
    return %1, %c0_i32_0 : i32, i32
  }
}

</mosaic_0001>

<bundles_post_ra>
// kernel: tpu_custom_call.1
= control target key start
LH: loop header
LB: loop body
LE: loop exit
PB: predicated region body
PF: predicated region fallthrough
CT: control target
= control target key end

     0   :  { %10 = vsyncpa [#allocation7], 0  ;;  %s921_s0 = inlined_call_operand.vmem [shape: f32[16,128], index: 0, kind: input, shape index: {}]   ;;  %s922_s1 = inlined_call_operand.hbm [shape: bf16[16,16], index: 1, kind: input, shape index: {}]   ;;  %s923_s2 = inlined_call_operand.vmem [shape: f32[16,1], index: 2, kind: input, shape index: {}]   ;;  %s924_s3 = inlined_call_operand.hbm [shape: bf16[128,128], index: 3, kind: input, shape index: {}]   ;;  %s925_s4 = inlined_call_operand.vmem [shape: f32[1,128], index: 4, kind: input, shape index: {}]   ;;  %s926_s5 = inlined_call_operand.hbm [shape: f32[16,128], index: 5, kind: output, shape index: {}]  }
   0x1   :  { %11 = vsyncpa [#allocation8], 0 }
   0x2   :  { %13 = vsyncpa [#allocation8 + $0x1], 0  ;;  %s839_s18 = smov 0   ;;  %s841_s19 = smov 0  }
   0x3   :  { %s843_s20 = smov 0  }
   0x4 LB: > { %s542_s21 = sadd.s32 4294967295, %s799_s20   ;;  %s543_s22 = sadd.s32 4294967294, %s799_s20   ;;  %s799_s20 = sphi %s843_s20, %s19_s20   ;;  %s795_s19 = sphi %s841_s19, %s929_s19   ;;  %s791_s18 = sphi %s839_s18, %s928_s18  }
   0x5   : > { %s31_s23 = sadd.s32 1, %s795_s19  ;;  %p544_p0 = scmp.ge.s32.totalorder %s799_s20, 1 }
   0x6   : > { %p33_p1 = scmp.ge.s32.totalorder %s31_s23, 4  ;;  %p129_p2 = scmp.lt.s32.totalorder %s799_s20, 5 }
   0x7   : > { %p861_p3 = scmp.eq.s32.totalorder %s542_s21, 0  ;;  %s143_s27 = sshll.u32 %s924_s3, 4  ;;  %s144_s27 = int_to_ptr.hbm [resolvable:$true] %s143_s27 }
   0x8   : > { %s931_s23 = smov (%p33_p1, %s31_s23), 0  ;;  %p130_p4 = pnand %p544_p0, %p129_p2 }
   0x9   : > { %s801_s28 = smov [#allocation6]   ;;  %s802_s30 = smov 64  }
   0xa   : > { %p636_p5 = pneg %p130_p4  ;;  %s145_s29 = sshll.u32 %s801_s28, 4  ;;  %s146_s29 = int_to_ptr.vmem [resolvable:$true] %s145_s29 }
   0xb   : > { %s803_s6 = smov 4   ;;  %164 = sbr.rel (%p130_p4) target bundleno = 370 (0x172), region = 32 }
   0xc   : > { %p637_p6 = pnand %p861_p3, %p636_p5 }
   0xe   : > { %639 = dma.hbm_to_vmem [thread:$0]  (!%p637_p6), %s144_s27, 1024, %s146_s29, [#allocation7], %s802_s30, %s802_s30, %s803_s6  }
  0x10   : > { %778 = dma.done.wait (%p861_p3), [#allocation7], 1024  }
  0x11   : > { %780 = vsyncadd (%p861_p3), [#allocation7], 4294966272  ;;  %p189_p7 = scmp.eq.s32.totalorder %s791_s18, 0 }
  0x12   : > { %v205_v0 = vld [vmem:[%s921_s0] sm:$0xff] (%p189_p7)  ;;  %v207_v1 = vld [vmem:[%s921_s0 + $0x8] sm:$0xff] (%p189_p7) }
  0x13   : > { %194 = sbr.rel (!%p189_p7) target bundleno = 34 (0x22), region = 40  ;;  %206 = vst [vmem:[#allocation2] sm:$0xff] (%p189_p7), %v205_v0 }
  0x14   : > { %208 = vst [vmem:[#allocation2 + $0x8] sm:$0xff] (%p189_p7), %v207_v1 }
  0x18   : > { %214 = vsyncadd [#allocation5], 256  ;;  %s223_s13 = sshll.u32 %s922_s1, 4  ;;  %s804_s14 = smov [#allocation4]   ;;  %s224_s13 = int_to_ptr.hbm [resolvable:$true] %s223_s13 }
  0x19   : > { %s225_s15 = sshll.u32 %s804_s14, 4  ;;  %s226_s15 = int_to_ptr.vmem [resolvable:$true] %s225_s15 }
  0x1a   : > { %228 = dma.hbm_to_vmem [thread:$0]  %s224_s13, 128, %s226_s15, [#allocation5 + $0x1] }
  0x1b   : > { %781 = dma.done.wait [#allocation5 + $0x1], 128 }
  0x1c   : > { %782 = vsyncadd [#allocation5 + $0x1], 4294967168 }
  0x1d   : > { %783 = dma.done.wait [#allocation5], 256 }
  0x1e   : > { %784 = vsyncadd [#allocation5], 4294967040  ;;  %v236_v2 = vld [vmem:[#allocation2] sm:$0xff]  ;;  %v237_v3 = vld [vmem:[#allocation2 + $0x8] sm:$0xff] }
  0x1f   : > { %v621_v4 = vpack.c.bf16 %v237_v3, %v236_v2 }
  0x21   : > { %622 = vst [vmem:[#allocation3] sm:$0xff] %v621_v4  }
  0x22 PF: > { %p242_p8 = scmp.lt.s32.totalorder %s791_s18, 0  ;;  %s243_s16 = ssub.s32 0, %s791_s18  ;;  %v264_v5 = vld [vmem:[%s923_s2] sm:$0xff]  ;;  %v805_v6 = vmov 0   ;;  %v265_v7 = vld [vmem:[%s923_s2 + $0x8] sm:$0xff]  ;;  %vm282_vm0 = vcmask 130048  }
  0x23   : > { %s549_s25 = smin.u32 %s791_s18, %s243_s16  ;;  %681 = vset.pattern.permute.xlu0 %v805_v6  ;;  %v606_v9 = vld [vmem:[#allocation4] sm:$0xff]  ;;  %p563_p10 = scmp.ge.s32.totalorder %s791_s18, 3 }
  0x24   : > { %s245_s26 = sand.u32 1, %s549_s25   ;;  %302 = vperm.xlu0 %681, %v264_v5   ;;  %v261_v11 = vld [vmem:[#allocation2] sm:$0xff] }
  0x25   : > { %s246_s27 = ssub.s32 0, %s245_s26  ;;  %v262_v18 = vld [vmem:[#allocation2 + $0x8] sm:$0xff] }
  0x26   : > { %s933_s27 = smov (!%p242_p8, %s246_s27), %s245_s26 }
  0x27   : > { %p551_p9 = scmp.lt.s32.totalorder %s933_s27, 0  ;;  %s252_s28 = sadd.s32 2, %s933_s27 }
  0x29   : > { %s935_s28 = smov (!%p551_p9, %s252_s28), %s933_s27 }
  0x2a   : > { %s607_s6 = sshll.u32 %s935_s28, 3  ;;  %s324_s8 = ssub.s32 (!%p563_p10), 1, %s935_s28 }
  0x2b   : > { %s268_s7 = scalar_lea.vmem [#allocation3], %s607_s6  ;;  %s609_s9 = sshll.u32 (!%p563_p10), %s324_s8, 3 }
  0x2c   : > { %307 = vperm.xlu0 %681, %v265_v7   ;;  %v608_v8 = vld [vmem:[%s268_s7] sm:$0xff]  ;;  %s328_s10 = scalar_lea.vmem (!%p563_p10), [#allocation3], %s609_s9 }
  0x2d   : > { %293 = vmatpush.bf16.msra.mxu0 %v608_v8 }
  0x30   : > { %562 = vmatmul.msk.bf16.vlgmr.msra.gmra.mxu0 %vm282_vm0, %v606_v9 }
  0x96   : > { %v303_v10 = vpop.permute.xlu0 %302 }
  0x97   : > { %v310_v12 = vmul.f32 %v303_v10, %v261_v11 }
  0x9e   : > { %v308_v17 = vpop.permute.xlu0 %307 }
  0x9f   : > { %v311_v20 = vmul.f32 %v308_v17, %v262_v18 }
  0xad   : > { %v295_v13 = vpop.f32.mrf.mxu0 }
  0xae   : > { %v312_v14 = vmul.f32 0.1, %v295_v13 }
  0xb0   : > { %v314_v15 = vadd.f32 %v312_v14, %v310_v12 }
  0xb2   : > { %316 = vst [vmem:[#allocation2] sm:$0xff] %v314_v15  ;;  %v318_v16 = vpack.c.bf16 %v314_v15, %v314_v15 }
  0xb5   : > { %v297_v19 = vpop.f32.mrf.mxu0 }
  0xb6   : > { %v313_v21 = vmul.f32 0.1, %v297_v19  ;;  %323 = sbr.rel (%p563_p10) target bundleno = 190 (0xbe), region = 67 }
  0xb8   : > { %v315_v22 = vadd.f32 %v313_v21, %v311_v20 }
  0xba   : > { %317 = vst [vmem:[#allocation2 + $0x8] sm:$0xff] %v315_v22  ;;  %v319_v23 = vpack.c.bf16 %v315_v22, %v315_v22 }
  0xbb   : > { %v626_v24 = vpack.c.bf16 %v315_v22, %v314_v15 }
  0xbd   : > { %627 = vst [vmem:[%s328_s10] sm:$0xff] %v626_v24  }
  0xbe PF: > { %p566_p11 = scmp.ne.s32.totalorder %s791_s18, 3 }
  0xc0   : > { %334 = sbr.rel (%p566_p11) target bundleno = 366 (0x16e), region = 71 }
  0xc5   : > { %v617_v25 = vld [vmem:[#allocation6 + $0x38] sm:$0xff]  ;;  %v616_v26 = vld [vmem:[#allocation6 + $0x30] sm:$0xff]  ;;  %v615_v27 = vld [vmem:[#allocation6 + $0x28] sm:$0xff]  ;;  %v357_v32 = vunpack.c.l.b16 %v318_v16  ;;  %v358_v33 = vunpack.c.l.b16 %v319_v23 }
  0xc6   : > { %409 = vmatpush.bf16.msra.mxu0 %v617_v25  ;;  %v614_v28 = vld [vmem:[#allocation6 + $0x20] sm:$0xff]  ;;  %v613_v29 = vld [vmem:[#allocation6 + $0x18] sm:$0xff]  ;;  %v612_v30 = vld [vmem:[#allocation6 + $0x10] sm:$0xff] }
  0xc7   : > { %v611_v31 = vld [vmem:[#allocation6 + $0x8] sm:$0xff]  ;;  %v610_v34 = vld [vmem:[#allocation6] sm:$0xff]  ;;  %v359_v35 = vpack.c.b16 %v358_v33, %v357_v32  ;;  %v682_v36 = vld [vmem:[%s925_s4] ss:$0 sm:$0xff] }
  0xca   : > { %410 = vmatpush.bf16.msra.mxu0 %v616_v26 }
  0xce   : > { %411 = vmatpush.bf16.msra.mxu0 %v615_v27 }
  0xd2   : > { %412 = vmatpush.bf16.msra.mxu0 %v614_v28 }
  0xd6   : > { %413 = vmatpush.bf16.msra.mxu0 %v613_v29 }
  0xda   : > { %414 = vmatpush.bf16.msra.mxu0 %v612_v30 }
  0xde   : > { %415 = vmatpush.bf16.msra.mxu0 %v611_v31 }
  0xe2   : > { %416 = vmatpush.bf16.msra.mxu0 %v610_v34 }
  0xe5   : > { %417 = vmatmul.bf16.vlgmr.msra.gmra.mxu0 %v359_v35 }
 0x162   : > { %v418_v37 = vpop.f32.mrf.mxu0 }
 0x163   : > { %v419_v38 = vadd.f32 %v682_v36, %v418_v37 }
 0x165   : > { %423 = vst [vmem:[#allocation9] sm:$0xff] %v419_v38 }
 0x16a   : > { %v420_v39 = vpop.f32.mrf.mxu0 }
 0x16b   : > { %v421_v40 = vadd.f32 %v682_v36, %v420_v39 }
 0x16d   : > { %424 = vst [vmem:[#allocation9 + $0x8] sm:$0xff] %v421_v40 }
 0x16e PF: > { %p646_p12 = scmp.eq.s32.totalorder %s542_s21, 3  ;;  %s442_s14 = sshll.u32 %s926_s5, 4  ;;  %s443_s14 = int_to_ptr.hbm [resolvable:$true] %s442_s14 }
 0x16f   : > { %s806_s15 = smov [#allocation9]   ;;  %s807_s17 = smov 128  }
 0x170   : > { %s440_s16 = sshll.u32 %s806_s15, 4  ;;  %s808_s24 = smov 8   ;;  %s441_s16 = int_to_ptr.vmem [resolvable:$true] %s440_s16 }
 0x171   : > { %633 = dma.vmem_to_hbm [thread:$0]  (%p646_p12), %s441_s16, 256, %s443_s14, [#allocation8], %s807_s17, %s807_s17, %s808_s24  }
 0x172 PF: > { %p647_p13 = scmp.ge.s32.totalorder %s799_s20, 2  ;;  %p648_p0 = scmp.eq.s32.totalorder %s543_s22, 3 }
 0x174   : > { %p641_p1 = pnand %p648_p0, %p647_p13 }
 0x176   : > { %p642_p2 = pneg %p641_p1 }
 0x178   : > { %786 = dma.done.wait (%p642_p2), [#allocation8], 256  }
 0x179   : > { %788 = vsyncadd (%p642_p2), [#allocation8], 4294967040  ;;  %s19_s20 = sadd.s32 1, %s799_s20   ;;  %s928_s18 = smov %s795_s19 }
 0x17a   : > { %p16_p3 = scmp.ge.s32.totalorder %s19_s20, 6   ;;  %s929_s19 = smov %s931_s23 }
 0x17c   :  { %18 = sbr.rel (!%p16_p3) target bundleno = 4 (0x4), region = 115 }
 0x181   :  { %464 = vsyncpa [#allocation7], 1 }
 0x182   :  { %466 = vsyncpa [#allocation7 + $0x1], 1 }
 0x183   :  { %467 = vsyncpa [#allocation8], 1 }
 0x184   :  { %469 = vsyncpa [#allocation8 + $0x1], 1 }
 0x185   :  { %470 = vsyncmov [#allocation5] }
 0x188   :  { %s471_s21 = vpop.sfrf %470 }
 0x189   :  { %p603_p4 = scmp.ne.s32.totalorder %s471_s21, 0 }
 0x18b   :  { %475 = shalt.err (%p603_p4)  }
 0x18c   :  { %477 = vsyncmov [#allocation5 + $0x1] }
 0x18f   :  { %s478_s22 = vpop.sfrf %477 }
 0x190   :  { %p604_p5 = scmp.ne.s32.totalorder %s478_s22, 0 }
 0x192   :  { %482 = shalt.err (%p604_p5)  }

</bundles_post_ra>
